<compile_context>
chip_gen: v7x
topology: tpu7x:2x2x1
jax: 0.10.0
libtpu: 0.0.40
codegen_flags: <defaults>
</compile_context>

<pallas_src>
import jax
import jax.numpy as jnp
from jax.experimental import pallas as pl
from jax.experimental.pallas import tpu as pltpu


def bn_relu_conv(x, gamma, beta, weight, bias, *, eps=1e-3, slope=0.2):
    """Forward of _BnReluConv (training-mode BN, stride=1).

    x:      (N, Cin, H, W)       float32
    gamma:  (Cin,)               BN weight
    beta:   (Cin,)               BN bias
    weight: (Cout, Cin, fw, fh)  conv weight (PyTorch OIHW)
    bias:   (Cout,)              conv bias
    returns (N, Cout, H, W)
    """
    N, Cin, H, W = x.shape
    Cout, _, fw, fh = weight.shape
    assert fw % 2 == 1 and fh % 2 == 1, "only odd kernel sizes supported"
    ph, pw = fw // 2, fh // 2
    Hp, Wp = H + 2 * ph, W + 2 * pw
    T = fw * fh

    x = x.astype(jnp.float32)

    # ---- BN training-mode batch statistics (two-pass centered form, matches PyTorch),
    #      folded into a per-channel affine (scale, shift). ----
    mean = jnp.mean(x, axis=(0, 2, 3))
    var = jnp.mean(jnp.square(x - mean[None, :, None, None]), axis=(0, 2, 3))
    scale = gamma.astype(jnp.float32) * jax.lax.rsqrt(var + eps)
    shift = beta.astype(jnp.float32) - mean * scale

    # ---- lane-dense host-side layouts (tiny glue arrays except x itself) ----
    # Activations: (N*H, W*Cin) so the lane dim is W*Cin (=64 here); rows are (n, h).
    x_2d = jnp.transpose(x, (0, 2, 3, 1)).reshape(N * H, W * Cin)
    sc_row = jnp.tile(scale, W).reshape(1, W * Cin)      # [w*Cin + c] = scale[c]
    sh_row = jnp.tile(shift, W).reshape(1, W * Cin)
    b_row = jnp.tile(bias.astype(jnp.float32), W).reshape(1, W * Cout)

    # Per-tap block-diagonal weights:
    #   wbd[t, w*Cin + c, v*Cout + o] = weight[o, c, di, dj] * (w == v),  t = di*fh + dj
    # so  slab(N*H, W*Cin) @ wbd[t]  contracts Cin independently per W position with no
    # reshapes, producing a lane-dense (N*H, W*Cout) partial result.
    w_t = jnp.transpose(weight.astype(jnp.float32), (2, 3, 1, 0)).reshape(T, Cin, Cout)
    eye_w = jnp.eye(W, dtype=jnp.float32)
    wbd = jnp.einsum("tco,wv->twcvo", w_t, eye_w).reshape(T, W * Cin, W * Cout)
    wbd = wbd.astype(jnp.bfloat16)                        # MXU-native, f32 accumulate

    def kernel(x_ref, sc_ref, sh_ref, w_ref, b_ref, o_ref, pad_ref):
        # --- zero the padded-activation scratch once (single grid step) ---
        pad_ref[...] = jnp.zeros_like(pad_ref)

        # --- BN affine + LeakyReLU(0.2): f32 elementwise on the VPU, (N*H, W*Cin) ---
        y = x_ref[...] * sc_ref[...] + sh_ref[...]
        y = jnp.where(y > 0.0, y, slope * y)

        # --- scatter each image's interior into its padded slab (zero halos around) ---
        for n in range(N):
            pad_ref[n * Hp + ph:n * Hp + ph + H,
                    pw * Cin:pw * Cin + W * Cin] = y[n * H:(n + 1) * H, :]

        # --- conv as fw*fh accumulating, relayout-free dots on lane-dense slabs ---
        acc = jnp.broadcast_to(b_ref[...], (N * H, W * Cout))        # f32 bias init
        for di in range(fw):
            for dj in range(fh):
                wt = w_ref[di * fh + dj]                              # (W*Cin, W*Cout) bf16
                slab = jnp.concatenate(
                    [pad_ref[n * Hp + di:n * Hp + di + H,
                             dj * Cin:dj * Cin + W * Cin] for n in range(N)],
                    axis=0)                                           # (N*H, W*Cin) f32
                acc = acc + jnp.dot(slab.astype(jnp.bfloat16), wt,
                                    preferred_element_type=jnp.float32)

        # --- single unmasked lane-dense store (W*Cout = 128 here) ---
        o_ref[...] = acc

    out_2d = pl.pallas_call(
        kernel,
        out_shape=jax.ShapeDtypeStruct((N * H, W * Cout), jnp.float32),
        grid_spec=pltpu.PrefetchScalarGridSpec(
            num_scalar_prefetch=0,
            grid=(1,),
            in_specs=[
                pl.BlockSpec((N * H, W * Cin), lambda i: (0, 0)),
                pl.BlockSpec((1, W * Cin), lambda i: (0, 0)),
                pl.BlockSpec((1, W * Cin), lambda i: (0, 0)),
                pl.BlockSpec((T, W * Cin, W * Cout), lambda i: (0, 0, 0)),
                pl.BlockSpec((1, W * Cout), lambda i: (0, 0)),
            ],
            out_specs=pl.BlockSpec((N * H, W * Cout), lambda i: (0, 0)),
            scratch_shapes=[
                pltpu.VMEM((N * Hp, Wp * Cin), jnp.float32),   # padded activations
            ],
        ),
        compiler_params=pltpu.CompilerParams(dimension_semantics=("arbitrary",)),
    )(x_2d, sc_row, sh_row, wbd, b_row)

    out = out_2d.reshape(N, H, W, Cout)
    return jnp.transpose(out, (0, 3, 1, 2))                   # back to NCHW


def ref_bn_relu_conv(x, gamma, beta, weight, bias, *, eps=1e-3, slope=0.2):
    """Pure-JAX reference matching PyTorch semantics (training-mode BN)."""
    Cout, _, fw, fh = weight.shape
    mean = jnp.mean(x, axis=(0, 2, 3), keepdims=True)
    var = jnp.mean((x - mean) ** 2, axis=(0, 2, 3), keepdims=True)
    y = (x - mean) / jnp.sqrt(var + eps)
    y = y * gamma[None, :, None, None] + beta[None, :, None, None]
    y = jnp.where(y > 0, y, slope * y)
    out = jax.lax.conv_general_dilated(
        y, weight, window_strides=(1, 1),
        padding=[(fw // 2, fw // 2), (fh // 2, fh // 2)],
        dimension_numbers=("NCHW", "OIHW", "NCHW"),
        precision=jax.lax.Precision.HIGHEST)
    return out + bias[None, :, None, None]


if __name__ == "__main__":
    # Small shapes consistent with the module: N=2, in_filters=4, nb_filters=8,
    # H=W=16, fw=fh=3, subsample=1.
    N, Cin, H, W = 2, 4, 16, 16
    Cout, fw, fh = 8, 3, 3

    key = jax.random.PRNGKey(0)
    kx, kw, kb = jax.random.split(key, 3)

    x = jax.random.normal(kx, (N, Cin, H, W), dtype=jnp.float32)
    # PyTorch BatchNorm2d default init: weight=1, bias=0.
    gamma = jnp.ones((Cin,), jnp.float32)
    beta = jnp.zeros((Cin,), jnp.float32)
    weight = 0.1 * jax.random.normal(kw, (Cout, Cin, fw, fh), dtype=jnp.float32)
    bias = 0.1 * jax.random.normal(kb, (Cout,), dtype=jnp.float32)

    out = bn_relu_conv(x, gamma, beta, weight, bias)
    out = jax.block_until_ready(out)

    ref = ref_bn_relu_conv(x, gamma, beta, weight, bias)
    assert out.shape == (N, Cout, H, W), out.shape
    err = float(jnp.max(jnp.abs(out - ref)))
    assert jnp.allclose(out, ref, atol=1e-2, rtol=1e-2), err

    print("KERNEL_OK")
</pallas_src>

<mosaic_0001>
module attributes {stable_mosaic.version = 11 : i64} {
  func.func @kernel(%arg0: i32, %arg1: memref<32x64xf32, #tpu.memory_space<vmem>>, %arg2: memref<1x64xf32, #tpu.memory_space<vmem>>, %arg3: memref<1x64xf32, #tpu.memory_space<vmem>>, %arg4: memref<9x64x128xbf16, #tpu.memory_space<vmem>>, %arg5: memref<1x128xf32, #tpu.memory_space<vmem>>, %arg6: memref<32x128xf32, #tpu.memory_space<vmem>>, %arg7: memref<36x72xf32, #tpu.memory_space<vmem>>) attributes {dimension_semantics = [#tpu.dimension_semantics<arbitrary>], iteration_bounds = array<i64: 1>, scalar_prefetch = 0 : i64, scratch_operands = 1 : i64, tpu.core_type = #tpu.core_type<tc>, window_params = [{pipeline_mode = #tpu.pipeline_mode<synchronous>, transform_indices = @transform_0, window_bounds = array<i64: 32, 64>}, {pipeline_mode = #tpu.pipeline_mode<synchronous>, transform_indices = @transform_1, window_bounds = array<i64: 1, 64>}, {pipeline_mode = #tpu.pipeline_mode<synchronous>, transform_indices = @transform_2, window_bounds = array<i64: 1, 64>}, {pipeline_mode = #tpu.pipeline_mode<synchronous>, transform_indices = @transform_3, window_bounds = array<i64: 9, 64, 128>}, {pipeline_mode = #tpu.pipeline_mode<synchronous>, transform_indices = @transform_4, window_bounds = array<i64: 1, 128>}, {pipeline_mode = #tpu.pipeline_mode<synchronous>, transform_indices = @transform_5, window_bounds = array<i64: 32, 128>}]} {
    %cst = arith.constant 0.000000e+00 : f32
    %0 = vector.broadcast %cst : f32 to vector<36x72xf32>
    %c0 = arith.constant 0 : index
    %c0_0 = arith.constant 0 : index
    %1 = vector.load %arg7[%c0, %c0_0] : memref<36x72xf32, #tpu.memory_space<vmem>>, vector<36x72xf32>
    tpu.vector_store %arg7[%c0, %c0_0], %0 {strides = array<i32>} : memref<36x72xf32, #tpu.memory_space<vmem>>, vector<36x72xf32>,
    %c0_1 = arith.constant 0 : index
    %c0_2 = arith.constant 0 : index
    %2 = vector.load %arg1[%c0_1, %c0_2] : memref<32x64xf32, #tpu.memory_space<vmem>>, vector<32x64xf32>
    %c0_3 = arith.constant 0 : index
    %c0_4 = arith.constant 0 : index
    %3 = vector.load %arg2[%c0_3, %c0_4] : memref<1x64xf32, #tpu.memory_space<vmem>>, vector<1x64xf32>
    %4 = vector.broadcast %3 : vector<1x64xf32> to vector<32x64xf32>
    %5 = arith.mulf %2, %4 : vector<32x64xf32>
    %c0_5 = arith.constant 0 : index
    %c0_6 = arith.constant 0 : index
    %6 = vector.load %arg3[%c0_5, %c0_6] : memref<1x64xf32, #tpu.memory_space<vmem>>, vector<1x64xf32>
    %7 = vector.broadcast %6 : vector<1x64xf32> to vector<32x64xf32>
    %8 = arith.addf %5, %7 : vector<32x64xf32>
    %cst_7 = arith.constant 0.000000e+00 : f32
    %9 = vector.broadcast %cst_7 : f32 to vector<32x64xf32>
    %10 = arith.cmpf ogt, %8, %9 : vector<32x64xf32>
    %cst_8 = arith.constant 2.000000e-01 : f32
    %11 = vector.broadcast %cst_8 : f32 to vector<32x64xf32>
    %12 = arith.mulf %11, %8 : vector<32x64xf32>
    %13 = arith.select %10, %8, %12 : vector<32x64xi1>, vector<32x64xf32>
    %14 = vector.extract_strided_slice %13 {offsets = [0, 0], sizes = [16, 64], strides = [1, 1]} : vector<32x64xf32> to vector<16x64xf32>
    %c1 = arith.constant 1 : index
    %c4 = arith.constant 4 : index
    %15 = vector.load %arg7[%c1, %c4] : memref<36x72xf32, #tpu.memory_space<vmem>>, vector<16x64xf32>
    tpu.vector_store %arg7[%c1, %c4], %14 {strides = array<i32>} : memref<36x72xf32, #tpu.memory_space<vmem>>, vector<16x64xf32>,
    %16 = vector.extract_strided_slice %13 {offsets = [16, 0], sizes = [16, 64], strides = [1, 1]} : vector<32x64xf32> to vector<16x64xf32>
    %c19 = arith.constant 19 : index
    %c4_9 = arith.constant 4 : index
    %17 = vector.load %arg7[%c19, %c4_9] : memref<36x72xf32, #tpu.memory_space<vmem>>, vector<16x64xf32>
    tpu.vector_store %arg7[%c19, %c4_9], %16 {strides = array<i32>} : memref<36x72xf32, #tpu.memory_space<vmem>>, vector<16x64xf32>,
    %c0_10 = arith.constant 0 : index
    %c0_11 = arith.constant 0 : index
    %18 = vector.load %arg5[%c0_10, %c0_11] : memref<1x128xf32, #tpu.memory_space<vmem>>, vector<1x128xf32>
    %19 = vector.shape_cast %18 : vector<1x128xf32> to vector<1x128xf32>
    %20 = vector.broadcast %19 : vector<1x128xf32> to vector<32x128xf32>
    %c0_12 = arith.constant 0 : index
    %c0_13 = arith.constant 0 : index
    %c0_14 = arith.constant 0 : index
    %21 = vector.load %arg4[%c0_12, %c0_13, %c0_14] : memref<9x64x128xbf16, #tpu.memory_space<vmem>>, vector<1x64x128xbf16>
    %22 = vector.shape_cast %21 : vector<1x64x128xbf16> to vector<64x128xbf16>
    %c0_15 = arith.constant 0 : index
    %c0_16 = arith.constant 0 : index
    %23 = vector.load %arg7[%c0_15, %c0_16] : memref<36x72xf32, #tpu.memory_space<vmem>>, vector<16x64xf32>
    %c18 = arith.constant 18 : index
    %c0_17 = arith.constant 0 : index
    %24 = vector.load %arg7[%c18, %c0_17] : memref<36x72xf32, #tpu.memory_space<vmem>>, vector<16x64xf32>
    %25 = tpu.concatenate %23, %24 in 0 : vector<16x64xf32>, vector<16x64xf32> -> vector<32x64xf32>
    %26 = arith.truncf %25 : vector<32x64xf32> to vector<32x64xbf16>
    %cst_18 = arith.constant dense<0.000000e+00> : vector<32x128xf32>
    %27 = tpu.matmul %26, %22, %cst_18 {dimension_numbers = #tpu.dot_dimension_numbers<[1], [0], [0], [1], [0, 0, 1, 1], [], []>} : vector<32x64xbf16>, vector<64x128xbf16>, vector<32x128xf32> -> vector<32x128xf32>
    %28 = arith.addf %20, %27 : vector<32x128xf32>
    %c1_19 = arith.constant 1 : index
    %c0_20 = arith.constant 0 : index
    %c0_21 = arith.constant 0 : index
    %29 = vector.load %arg4[%c1_19, %c0_20, %c0_21] : memref<9x64x128xbf16, #tpu.memory_space<vmem>>, vector<1x64x128xbf16>
    %30 = vector.shape_cast %29 : vector<1x64x128xbf16> to vector<64x128xbf16>
    %c0_22 = arith.constant 0 : index
    %c4_23 = arith.constant 4 : index
    %31 = vector.load %arg7[%c0_22, %c4_23] : memref<36x72xf32, #tpu.memory_space<vmem>>, vector<16x64xf32>
    %c18_24 = arith.constant 18 : index
    %c4_25 = arith.constant 4 : index
    %32 = vector.load %arg7[%c18_24, %c4_25] : memref<36x72xf32, #tpu.memory_space<vmem>>, vector<16x64xf32>
    %33 = tpu.concatenate %31, %32 in 0 : vector<16x64xf32>, vector<16x64xf32> -> vector<32x64xf32>
    %34 = arith.truncf %33 : vector<32x64xf32> to vector<32x64xbf16>
    %cst_26 = arith.constant dense<0.000000e+00> : vector<32x128xf32>
    %35 = tpu.matmul %34, %30, %cst_26 {dimension_numbers = #tpu.dot_dimension_numbers<[1], [0], [0], [1], [0, 0, 1, 1], [], []>} : vector<32x64xbf16>, vector<64x128xbf16>, vector<32x128xf32> -> vector<32x128xf32>
    %36 = arith.addf %28, %35 : vector<32x128xf32>
    %c2 = arith.constant 2 : index
    %c0_27 = arith.constant 0 : index
    %c0_28 = arith.constant 0 : index
    %37 = vector.load %arg4[%c2, %c0_27, %c0_28] : memref<9x64x128xbf16, #tpu.memory_space<vmem>>, vector<1x64x128xbf16>
    %38 = vector.shape_cast %37 : vector<1x64x128xbf16> to vector<64x128xbf16>
    %c0_29 = arith.constant 0 : index
    %c8 = arith.constant 8 : index
    %39 = vector.load %arg7[%c0_29, %c8] : memref<36x72xf32, #tpu.memory_space<vmem>>, vector<16x64xf32>
    %c18_30 = arith.constant 18 : index
    %c8_31 = arith.constant 8 : index
    %40 = vector.load %arg7[%c18_30, %c8_31] : memref<36x72xf32, #tpu.memory_space<vmem>>, vector<16x64xf32>
    %41 = tpu.concatenate %39, %40 in 0 : vector<16x64xf32>, vector<16x64xf32> -> vector<32x64xf32>
    %42 = arith.truncf %41 : vector<32x64xf32> to vector<32x64xbf16>
    %cst_32 = arith.constant dense<0.000000e+00> : vector<32x128xf32>
    %43 = tpu.matmul %42, %38, %cst_32 {dimension_numbers = #tpu.dot_dimension_numbers<[1], [0], [0], [1], [0, 0, 1, 1], [], []>} : vector<32x64xbf16>, vector<64x128xbf16>, vector<32x128xf32> -> vector<32x128xf32>
    %44 = arith.addf %36, %43 : vector<32x128xf32>
    %c3 = arith.constant 3 : index
    %c0_33 = arith.constant 0 : index
    %c0_34 = arith.constant 0 : index
    %45 = vector.load %arg4[%c3, %c0_33, %c0_34] : memref<9x64x128xbf16, #tpu.memory_space<vmem>>, vector<1x64x128xbf16>
    %46 = vector.shape_cast %45 : vector<1x64x128xbf16> to vector<64x128xbf16>
    %c1_35 = arith.constant 1 : index
    %c0_36 = arith.constant 0 : index
    %47 = vector.load %arg7[%c1_35, %c0_36] : memref<36x72xf32, #tpu.memory_space<vmem>>, vector<16x64xf32>
    %c19_37 = arith.constant 19 : index
    %c0_38 = arith.constant 0 : index
    %48 = vector.load %arg7[%c19_37, %c0_38] : memref<36x72xf32, #tpu.memory_space<vmem>>, vector<16x64xf32>
    %49 = tpu.concatenate %47, %48 in 0 : vector<16x64xf32>, vector<16x64xf32> -> vector<32x64xf32>
    %50 = arith.truncf %49 : vector<32x64xf32> to vector<32x64xbf16>
    %cst_39 = arith.constant dense<0.000000e+00> : vector<32x128xf32>
    %51 = tpu.matmul %50, %46, %cst_39 {dimension_numbers = #tpu.dot_dimension_numbers<[1], [0], [0], [1], [0, 0, 1, 1], [], []>} : vector<32x64xbf16>, vector<64x128xbf16>, vector<32x128xf32> -> vector<32x128xf32>
    %52 = arith.addf %44, %51 : vector<32x128xf32>
    %c4_40 = arith.constant 4 : index
    %c0_41 = arith.constant 0 : index
    %c0_42 = arith.constant 0 : index
    %53 = vector.load %arg4[%c4_40, %c0_41, %c0_42] : memref<9x64x128xbf16, #tpu.memory_space<vmem>>, vector<1x64x128xbf16>
    %54 = vector.shape_cast %53 : vector<1x64x128xbf16> to vector<64x128xbf16>
    %c1_43 = arith.constant 1 : index
    %c4_44 = arith.constant 4 : index
    %55 = vector.load %arg7[%c1_43, %c4_44] : memref<36x72xf32, #tpu.memory_space<vmem>>, vector<16x64xf32>
    %c19_45 = arith.constant 19 : index
    %c4_46 = arith.constant 4 : index
    %56 = vector.load %arg7[%c19_45, %c4_46] : memref<36x72xf32, #tpu.memory_space<vmem>>, vector<16x64xf32>
    %57 = tpu.concatenate %55, %56 in 0 : vector<16x64xf32>, vector<16x64xf32> -> vector<32x64xf32>
    %58 = arith.truncf %57 : vector<32x64xf32> to vector<32x64xbf16>
    %cst_47 = arith.constant dense<0.000000e+00> : vector<32x128xf32>
    %59 = tpu.matmul %58, %54, %cst_47 {dimension_numbers = #tpu.dot_dimension_numbers<[1], [0], [0], [1], [0, 0, 1, 1], [], []>} : vector<32x64xbf16>, vector<64x128xbf16>, vector<32x128xf32> -> vector<32x128xf32>
    %60 = arith.addf %52, %59 : vector<32x128xf32>
    %c5 = arith.constant 5 : index
    %c0_48 = arith.constant 0 : index
    %c0_49 = arith.constant 0 : index
    %61 = vector.load %arg4[%c5, %c0_48, %c0_49] : memref<9x64x128xbf16, #tpu.memory_space<vmem>>, vector<1x64x128xbf16>
    %62 = vector.shape_cast %61 : vector<1x64x128xbf16> to vector<64x128xbf16>
    %c1_50 = arith.constant 1 : index
    %c8_51 = arith.constant 8 : index
    %63 = vector.load %arg7[%c1_50, %c8_51] : memref<36x72xf32, #tpu.memory_space<vmem>>, vector<16x64xf32>
    %c19_52 = arith.constant 19 : index
    %c8_53 = arith.constant 8 : index
    %64 = vector.load %arg7[%c19_52, %c8_53] : memref<36x72xf32, #tpu.memory_space<vmem>>, vector<16x64xf32>
    %65 = tpu.concatenate %63, %64 in 0 : vector<16x64xf32>, vector<16x64xf32> -> vector<32x64xf32>
    %66 = arith.truncf %65 : vector<32x64xf32> to vector<32x64xbf16>
    %cst_54 = arith.constant dense<0.000000e+00> : vector<32x128xf32>
    %67 = tpu.matmul %66, %62, %cst_54 {dimension_numbers = #tpu.dot_dimension_numbers<[1], [0], [0], [1], [0, 0, 1, 1], [], []>} : vector<32x64xbf16>, vector<64x128xbf16>, vector<32x128xf32> -> vector<32x128xf32>
    %68 = arith.addf %60, %67 : vector<32x128xf32>
    %c6 = arith.constant 6 : index
    %c0_55 = arith.constant 0 : index
    %c0_56 = arith.constant 0 : index
    %69 = vector.load %arg4[%c6, %c0_55, %c0_56] : memref<9x64x128xbf16, #tpu.memory_space<vmem>>, vector<1x64x128xbf16>
    %70 = vector.shape_cast %69 : vector<1x64x128xbf16> to vector<64x128xbf16>
    %c2_57 = arith.constant 2 : index
    %c0_58 = arith.constant 0 : index
    %71 = vector.load %arg7[%c2_57, %c0_58] : memref<36x72xf32, #tpu.memory_space<vmem>>, vector<16x64xf32>
    %c20 = arith.constant 20 : index
    %c0_59 = arith.constant 0 : index
    %72 = vector.load %arg7[%c20, %c0_59] : memref<36x72xf32, #tpu.memory_space<vmem>>, vector<16x64xf32>
    %73 = tpu.concatenate %71, %72 in 0 : vector<16x64xf32>, vector<16x64xf32> -> vector<32x64xf32>
    %74 = arith.truncf %73 : vector<32x64xf32> to vector<32x64xbf16>
    %cst_60 = arith.constant dense<0.000000e+00> : vector<32x128xf32>
    %75 = tpu.matmul %74, %70, %cst_60 {dimension_numbers = #tpu.dot_dimension_numbers<[1], [0], [0], [1], [0, 0, 1, 1], [], []>} : vector<32x64xbf16>, vector<64x128xbf16>, vector<32x128xf32> -> vector<32x128xf32>
    %76 = arith.addf %68, %75 : vector<32x128xf32>
    %c7 = arith.constant 7 : index
    %c0_61 = arith.constant 0 : index
    %c0_62 = arith.constant 0 : index
    %77 = vector.load %arg4[%c7, %c0_61, %c0_62] : memref<9x64x128xbf16, #tpu.memory_space<vmem>>, vector<1x64x128xbf16>
    %78 = vector.shape_cast %77 : vector<1x64x128xbf16> to vector<64x128xbf16>
    %c2_63 = arith.constant 2 : index
    %c4_64 = arith.constant 4 : index
    %79 = vector.load %arg7[%c2_63, %c4_64] : memref<36x72xf32, #tpu.memory_space<vmem>>, vector<16x64xf32>
    %c20_65 = arith.constant 20 : index
    %c4_66 = arith.constant 4 : index
    %80 = vector.load %arg7[%c20_65, %c4_66] : memref<36x72xf32, #tpu.memory_space<vmem>>, vector<16x64xf32>
    %81 = tpu.concatenate %79, %80 in 0 : vector<16x64xf32>, vector<16x64xf32> -> vector<32x64xf32>
    %82 = arith.truncf %81 : vector<32x64xf32> to vector<32x64xbf16>
    %cst_67 = arith.constant dense<0.000000e+00> : vector<32x128xf32>
    %83 = tpu.matmul %82, %78, %cst_67 {dimension_numbers = #tpu.dot_dimension_numbers<[1], [0], [0], [1], [0, 0, 1, 1], [], []>} : vector<32x64xbf16>, vector<64x128xbf16>, vector<32x128xf32> -> vector<32x128xf32>
    %84 = arith.addf %76, %83 : vector<32x128xf32>
    %c8_68 = arith.constant 8 : index
    %c0_69 = arith.constant 0 : index
    %c0_70 = arith.constant 0 : index
    %85 = vector.load %arg4[%c8_68, %c0_69, %c0_70] : memref<9x64x128xbf16, #tpu.memory_space<vmem>>, vector<1x64x128xbf16>
    %86 = vector.shape_cast %85 : vector<1x64x128xbf16> to vector<64x128xbf16>
    %c2_71 = arith.constant 2 : index
    %c8_72 = arith.constant 8 : index
    %87 = vector.load %arg7[%c2_71, %c8_72] : memref<36x72xf32, #tpu.memory_space<vmem>>, vector<16x64xf32>
    %c20_73 = arith.constant 20 : index
    %c8_74 = arith.constant 8 : index
    %88 = vector.load %arg7[%c20_73, %c8_74] : memref<36x72xf32, #tpu.memory_space<vmem>>, vector<16x64xf32>
    %89 = tpu.concatenate %87, %88 in 0 : vector<16x64xf32>, vector<16x64xf32> -> vector<32x64xf32>
    %90 = arith.truncf %89 : vector<32x64xf32> to vector<32x64xbf16>
    %cst_75 = arith.constant dense<0.000000e+00> : vector<32x128xf32>
    %91 = tpu.matmul %90, %86, %cst_75 {dimension_numbers = #tpu.dot_dimension_numbers<[1], [0], [0], [1], [0, 0, 1, 1], [], []>} : vector<32x64xbf16>, vector<64x128xbf16>, vector<32x128xf32> -> vector<32x128xf32>
    %92 = arith.addf %84, %91 : vector<32x128xf32>
    %c0_76 = arith.constant 0 : index
    %c0_77 = arith.constant 0 : index
    %93 = vector.load %arg6[%c0_76, %c0_77] : memref<32x128xf32, #tpu.memory_space<vmem>>, vector<32x128xf32>
    tpu.vector_store %arg6[%c0_76, %c0_77], %92 {strides = array<i32>} : memref<32x128xf32, #tpu.memory_space<vmem>>, vector<32x128xf32>,
    return
  }
  func.func @transform_0(%arg0: i32) -> (i32, i32) {
    %c0_i32 = arith.constant 0 : i32
    %c0_i32_0 = arith.constant 0 : i32
    %c0_i32_1 = arith.constant 0 : i32
    return %c0_i32, %c0_i32_0 : i32, i32
  }
  func.func @transform_1(%arg0: i32) -> (i32, i32) {
    %c0_i32 = arith.constant 0 : i32
    %c0_i32_0 = arith.constant 0 : i32
    %c0_i32_1 = arith.constant 0 : i32
    return %c0_i32, %c0_i32_0 : i32, i32
  }
  func.func @transform_2(%arg0: i32) -> (i32, i32) {
    %c0_i32 = arith.constant 0 : i32
    %c0_i32_0 = arith.constant 0 : i32
    %c0_i32_1 = arith.constant 0 : i32
    return %c0_i32, %c0_i32_0 : i32, i32
  }
  func.func @transform_3(%arg0: i32) -> (i32, i32, i32) {
    %c0_i32 = arith.constant 0 : i32
    %c0_i32_0 = arith.constant 0 : i32
    %c0_i32_1 = arith.constant 0 : i32
    %c0_i32_2 = arith.constant 0 : i32
    return %c0_i32, %c0_i32_0, %c0_i32_1 : i32, i32, i32
  }
  func.func @transform_4(%arg0: i32) -> (i32, i32) {
    %c0_i32 = arith.constant 0 : i32
    %c0_i32_0 = arith.constant 0 : i32
    %c0_i32_1 = arith.constant 0 : i32
    return %c0_i32, %c0_i32_0 : i32, i32
  }
  func.func @transform_5(%arg0: i32) -> (i32, i32) {
    %c0_i32 = arith.constant 0 : i32
    %c0_i32_0 = arith.constant 0 : i32
    %c0_i32_1 = arith.constant 0 : i32
    return %c0_i32, %c0_i32_0 : i32, i32
  }
}

</mosaic_0001>

<bundles_post_ra>
// kernel: tpu_custom_call.1
= control target key start
LH: loop header
LB: loop body
LE: loop exit
PB: predicated region body
PF: predicated region fallthrough
CT: control target
= control target key end

     0   :  { %10 = vsyncpa [#allocation4], 0  ;;  %s1529_s0 = inlined_call_operand.hbm [shape: f32[32,64], index: 0, kind: input, shape index: {}]   ;;  %s1530_s1 = inlined_call_operand.vmem [shape: f32[1,64], index: 1, kind: input, shape index: {}]   ;;  %s1531_s2 = inlined_call_operand.vmem [shape: f32[1,64], index: 2, kind: input, shape index: {}]   ;;  %s1532_s3 = inlined_call_operand.hbm [shape: bf16[9,64,128], index: 3, kind: input, shape index: {}]   ;;  %s1533_s4 = inlined_call_operand.vmem [shape: f32[1,128], index: 4, kind: input, shape index: {}]   ;;  %s1534_s5 = inlined_call_operand.hbm [shape: f32[32,128], index: 5, kind: output, shape index: {}]  }
   0x1   :  { %11 = vsyncpa [#allocation7], 0 }
   0x2   :  { %12 = vsyncpa [#allocation5], 0  ;;  %s1394_s18 = smov [#allocation3]   ;;  %s1322_s22 = scalar_lea.hbm %s1529_s0, 512 }
   0x3   :  { %s18_s19 = sshll.u32 %s1394_s18, 4  ;;  %p1323_p0 = scmp.ne.s32.totalorder %s1529_s0, %s1322_s22  ;;  %s19_s19 = int_to_ptr.vmem [resolvable:$true] %s18_s19 }
   0x4   :  { %p1326_p1 = scmp.lt.u32.totalorder %s1322_s22, %s1529_s0 }
   0x6   :  { %p1328_p2 = pnand %p1326_p1, %p1323_p0 }
   0x8   :  { %1331 = shalt.err (!%p1328_p2)
}
   0x9   :  { %s1332_s27 = scalar_lea.vmem %s19_s19, 512  ;;  %p1337_p4 = scmp.lt.s32.totalorder %s19_s19, %s19_s19 }
   0xa   :  { %p1333_p3 = scmp.ne.s32.totalorder %s19_s19, %s1332_s27  ;;  %p1338_p5 = scmp.lt.s32.totalorder %s1332_s27, %s1332_s27 }
   0xc   :  { %p1339_p6 = por %p1338_p5, %p1337_p4 }
   0xe   :  { %p1340_p7 = pnand %p1339_p6, %p1333_p3 }
  0x10   :  { %1343 = shalt.err (!%p1340_p7)
}
  0x11   :  { %s1395_s28 = smov 128   ;;  %s1396_s29 = smov 8  }
  0x12   :  { %24 = dma.hbm_to_vmem [thread:$0]  %s1529_s0, 512, %s19_s19, [#allocation4], %s1395_s28, %s1395_s28, %s1396_s29  }
  0x13   :  { %s1397_s7 = smov [#allocation6]   ;;  %s1344_s11 = scalar_lea.hbm %s1532_s3, 4608 }
  0x14   :  { %s34_s8 = sshll.u32 %s1397_s7, 4  ;;  %p1345_p8 = scmp.ne.s32.totalorder %s1532_s3, %s1344_s11  ;;  %s35_s8 = int_to_ptr.vmem [resolvable:$true] %s34_s8 }
  0x15   :  { %p1348_p9 = scmp.lt.u32.totalorder %s1344_s11, %s1532_s3 }
  0x17   :  { %p1350_p10 = pnand %p1348_p9, %p1345_p8 }
  0x19   :  { %1353 = shalt.err (!%p1350_p10)
}
  0x1a   :  { %s1354_s16 = scalar_lea.vmem %s35_s8, 4608  ;;  %p1359_p12 = scmp.lt.s32.totalorder %s35_s8, %s35_s8 }
  0x1b   :  { %p1355_p11 = scmp.ne.s32.totalorder %s35_s8, %s1354_s16  ;;  %p1360_p13 = scmp.lt.s32.totalorder %s1354_s16, %s1354_s16 }
  0x1d   :  { %p1361_p0 = por %p1360_p13, %p1359_p12 }
  0x1f   :  { %p1362_p1 = pnand %p1361_p0, %p1355_p11 }
  0x21   :  { %1365 = shalt.err (!%p1362_p1)
}
  0x22   :  { %s1398_s0 = smov 64   ;;  %s1399_s17 = smov 4  }
  0x23   :  { %40 = dma.hbm_to_vmem [thread:$0]  %s1532_s3, 4608, %s35_s8, [#allocation7], %s1398_s0, %s1398_s0, %s1399_s17  }
  0x24   :  { %1388 = dma.done.wait [#allocation4], 512  }
  0x25   :  { %1389 = vsyncadd [#allocation4], 4294966784 }
  0x26   :  { %1390 = dma.done.wait [#allocation7], 4608  }
  0x27   :  { %1391 = vsyncadd [#allocation7], 4294962688  ;;  %vm50_vm0 = vcmask 588800   ;;  %v1400_v0 = vmov 0.0   ;;  %vm55_vm1 = vcmask 584704   ;;  %v59_v1 = vld [vmem:[#allocation3 + $0x10] sm:$0xff] }
  0x28   :  { %53 = vst.msk [vmem:[#allocation2 + $0x10] sm:$0xff] %vm50_vm0, %v1400_v0  ;;  %54 = vst.msk [vmem:[#allocation2 + $0x18] sm:$0xff] %vm50_vm0, %v1400_v0  ;;  %v1021_v2 = vld [vmem:[%s1530_s1] ss:$0 sm:$0xff]  ;;  %v57_v5 = vld [vmem:[#allocation3] sm:$0xff]  ;;  %vm103_vm6 = vcmask 556064  }
  0x29   :  { %51 = vst.msk [vmem:[#allocation2] sm:$0xff] %vm50_vm0, %v1400_v0  ;;  %52 = vst.msk [vmem:[#allocation2 + $0x8] sm:$0xff] %vm50_vm0, %v1400_v0  ;;  %v1022_v3 = vld [vmem:[%s1531_s2] ss:$0 sm:$0xff]  ;;  %v70_v4 = vmul.f32 %v1021_v2, %v59_v1  ;;  %v58_v7 = vld [vmem:[#allocation3 + $0x8] sm:$0xff]  ;;  %v68_v8 = vmul.f32 %v1021_v2, %v57_v5  ;;  %vm161_vm7 = vcmask 523264  }
  0x2a   :  { %56 = vst.msk [vmem:[#allocation2 + $0x20] sm:$0xf] %vm55_vm1, %v1400_v0  ;;  %v60_v6 = vld [vmem:[#allocation3 + $0x18] sm:$0xff]  ;;  %v69_v10 = vmul.f32 %v1021_v2, %v58_v7  ;;  %v1286_v11 = vld [vmem:[#allocation6] sm:$0xff]   ;;  %v1287_v13 = vld [vmem:[#allocation6 + $0x8] sm:$0xff]   ;;  %s1401_s1 = smov 124  }
  0x2b   :  { %v71_v9 = vmul.f32 %v1021_v2, %v60_v6  ;;  %v81_v12 = vadd.f32 %v1022_v3, %v70_v4  ;;  %v79_v14 = vadd.f32 %v1022_v3, %v68_v8  ;;  %1132 = vmatprep.subr.bf16.mxu1 %v1286_v11  ;;  %v1288_v18 = vld [vmem:[#allocation6 + $0x10] sm:$0xff]   ;;  %v1289_v25 = vld [vmem:[#allocation6 + $0x18] sm:$0xff]   ;;  %v1290_v27 = vld [vmem:[#allocation6 + $0x80] sm:$0xff]   ;;  %s1402_s2 = smov 120   ;;  %s1403_s25 = smov [#allocation8]  }
  0x2c   :  { %v80_v16 = vadd.f32 %v1022_v3, %v69_v10  ;;  %1133 = vmatpush3.bf16.msra.mxu1 %v1286_v11  ;;  %v1291_v28 = vld [vmem:[#allocation6 + $0x88] sm:$0xff]   ;;  %v1292_v29 = vld [vmem:[#allocation6 + $0x20] sm:$0xff]   ;;  %1180 = vmatprep.subr.bf16.mxu0 %v1290_v27  ;;  %v1293_v30 = vld [vmem:[#allocation6 + $0x90] sm:$0xff]   ;;  %s1008_s26 = sshll.u32 %s1403_s25, 4  ;;  %s1009_s26 = int_to_ptr.vmem [resolvable:$true] %s1008_s26 }
  0x2d   :  { %v82_v15 = vadd.f32 %v1022_v3, %v71_v9  ;;  %vm85_vm2 = vcmp.gt.f32.partialorder %v81_v12, 0.0  ;;  %v89_v17 = vmul.f32 0.2, %v81_v12  ;;  %vm83_vm3 = vcmp.gt.f32.partialorder %v79_v14, 0.0  ;;  %1134 = vmatprep.subr.bf16.mxu1 %v1287_v13  ;;  %1181 = vmatpush3.bf16.msra.mxu0 %v1290_v27  ;;  %v1295_v31 = vld [vmem:[#allocation6 + $0x98] sm:$0xff]   ;;  %v1297_v34 = vld [vmem:[#allocation6 + $0xa0] sm:$0xff]   ;;  %p1371_p3 = scmp.lt.s32.totalorder %s1009_s26, %s1009_s26 }
  0x2e   :  { %v87_v19 = vmul.f32 0.2, %v79_v14  ;;  %vm84_vm5 = vcmp.gt.f32.partialorder %v80_v16, 0.0  ;;  %v88_v22 = vmul.f32 0.2, %v80_v16  ;;  %1182 = vmatprep.subr.bf16.mxu0 %v1291_v28  ;;  %v1294_v49 = vld [vmem:[#allocation6 + $0x28] sm:$0xff]  }
  0x2f   :  { %vm86_vm4 = vcmp.gt.f32.partialorder %v82_v15, 0.0  ;;  %v90_v20 = vmul.f32 0.2, %v82_v15  ;;  %v93_v21 = vsel %vm85_vm2, %v81_v12, %v89_v17  ;;  %v1296_v50 = vld [vmem:[#allocation6 + $0x30] sm:$0xff]   ;;  %v1298_v51 = vld [vmem:[#allocation6 + $0x38] sm:$0xff]   ;;  %v1300_v56 = vld [vmem:[#allocation6 + $0x40] sm:$0xff]  }
  0x30   :  { %108 = vrot.lane.b32.xlu1 %v93_v21, %s1399_s17  ;;  %v91_v23 = vsel %vm83_vm3, %v79_v14, %v87_v19  ;;  %1135 = vmatpush3.bf16.msra.mxu1 %v1287_v13  ;;  %v92_v26 = vsel %vm84_vm5, %v80_v16, %v88_v22  ;;  %v1299_v61 = vld [vmem:[#allocation6 + $0xa8] sm:$0xff]   ;;  %v1301_v0 = vld [vmem:[#allocation6 + $0xb0] sm:$0xff]   ;;  %v1303_v4 = vld [vmem:[#allocation6 + $0xb8] sm:$0xff]  }
  0x31   :  { %97 = vrot.lane.b32.xlu0 %v91_v23, %s1399_s17  ;;  %v94_v24 = vsel %vm86_vm4, %v82_v15, %v90_v20  ;;  %1136 = vmatprep.subr.bf16.mxu1 %v1288_v18  ;;  %v1302_v3 = vld [vmem:[#allocation6 + $0x48] sm:$0xff]   ;;  %v1304_v6 = vld [vmem:[#allocation6 + $0x50] sm:$0xff]   ;;  %v1305_v7 = vld [vmem:[#allocation6 + $0xc0] sm:$0xff]  }
  0x32   :  { %1183 = vmatpush3.bf16.msra.mxu0 %v1291_v28  ;;  %v1306_v8 = vld [vmem:[#allocation6 + $0x58] sm:$0xff]   ;;  %v1307_v9 = vld [vmem:[#allocation6 + $0xc8] sm:$0xff]   ;;  %v1308_v10 = vld [vmem:[#allocation6 + $0x60] sm:$0xff]  }
  0x33   :  { %1184 = vmatprep.subr.bf16.mxu0 %v1293_v30  ;;  %v1309_v11 = vld [vmem:[#allocation6 + $0xd0] sm:$0xff]   ;;  %v1310_v12 = vld [vmem:[#allocation6 + $0x68] sm:$0xff]   ;;  %v1311_v14 = vld [vmem:[#allocation6 + $0xd8] sm:$0xff]  }
  0x34   :  { %110 = vrot.lane.b32.xlu1 %v94_v24, %s1399_s17  ;;  %1137 = vmatpush3.bf16.msra.mxu1 %v1288_v18  ;;  %v1312_v15 = vld [vmem:[#allocation6 + $0x70] sm:$0xff]   ;;  %v1313_v16 = vld [vmem:[#allocation6 + $0xe0] sm:$0xff]   ;;  %v1314_v17 = vld [vmem:[#allocation6 + $0x78] sm:$0xff]  }
  0x35   :  { %99 = vrot.lane.b32.xlu0 %v92_v26, %s1399_s17  ;;  %1138 = vmatprep.subr.bf16.mxu1 %v1289_v25  ;;  %v1315_v18 = vld [vmem:[#allocation6 + $0xe8] sm:$0xff]   ;;  %v1316_v20 = vld [vmem:[#allocation6 + $0xf0] sm:$0xff]   ;;  %v1317_v21 = vld [vmem:[#allocation6 + $0xf8] sm:$0xff]  }
  0x36   :  { %1185 = vmatpush3.bf16.msra.mxu0 %v1293_v30  ;;  %v1318_v22 = vld [vmem:[#allocation6 + $0x100] sm:$0xff]   ;;  %v1319_v23 = vld [vmem:[#allocation6 + $0x108] sm:$0xff]   ;;  %v1320_v26 = vld [vmem:[#allocation6 + $0x110] sm:$0xff]  }
  0x37   :  { %1186 = vmatprep.subr.bf16.mxu0 %v1295_v31  ;;  %v1321_v27 = vld [vmem:[#allocation6 + $0x118] sm:$0xff]  }
  0x38   :  { %1139 = vmatpush3.bf16.msra.mxu1 %v1289_v25 }
  0x39   :  { %1144 = vmatprep.subr.bf16.mxu1 %v1292_v29 }
  0x3a   :  { %1187 = vmatpush3.bf16.msra.mxu0 %v1295_v31 }
  0x3b   :  { %1192 = vmatprep.subr.bf16.mxu0 %v1297_v34 }
  0xa2   :  { %v109_v32 = vpop.permute.xlu1 %108 }
  0xa3   :  { %114 = vst.msk [vmem:[#allocation2 + $0x13] sm:$0xff] %vm103_vm6, %v109_v32  ;;  %v98_v33 = vpop.permute.xlu0 %97 }
  0xa4   :  { %104 = vst.msk [vmem:[#allocation2 + $0x1] sm:$0xff] %vm103_vm6, %v98_v33  ;;  %v1023_v33 = vld [vmem:[%s1533_s4] ss:$0 sm:$0xff]  ;;  %s1366_s4 = scalar_lea.vmem %s1009_s26, 512 }
  0xa5   :  { %p1367_p2 = scmp.ne.s32.totalorder %s1009_s26, %s1366_s4  ;;  %p1372_p4 = scmp.lt.s32.totalorder %s1366_s4, %s1366_s4 }
  0xa6   :  { %v111_v35 = vpop.permute.xlu1 %110 }
  0xa7   :  { %115 = vst.msk [vmem:[#allocation2 + $0x1b] sm:$0xff] %vm103_vm6, %v111_v35  ;;  %v100_v36 = vpop.permute.xlu0 %99  ;;  %p1373_p5 = por %p1372_p4, %p1371_p3 }
  0xa8   :  { %105 = vst.msk [vmem:[#allocation2 + $0x9] sm:$0xff] %vm103_vm6, %v100_v36 }
  0xa9   :  { %p1374_p6 = pnand %p1373_p5, %p1367_p2 }
  0xaa   :  { %v426_v37 = vld [vmem:[#allocation2 + $0x13] sm:$0xff] }
  0xab   :  { %v133_v38 = vld [vmem:[#allocation2 + $0x12] sm:$0xff]  ;;  %v424_v40 = vld [vmem:[#allocation2 + $0x1] sm:$0xff] }
  0xac   :  { %v131_v44 = vld [vmem:[#allocation2] sm:$0xff] }
  0xae   :  { %v427_v39 = vld [vmem:[#allocation2 + $0x1b] sm:$0xff] }
  0xaf   :  { %v134_v41 = vld [vmem:[#allocation2 + $0x1a] sm:$0xff]  ;;  %v1472_v42 = vpack.c.bf16 %v427_v39, %v426_v37  ;;  %v425_v43 = vld [vmem:[#allocation2 + $0x9] sm:$0xff] }
  0xb0   :  { %v132_v45 = vld [vmem:[#allocation2 + $0x8] sm:$0xff]  ;;  %v136_v46 = vpack.c.bf16 %v134_v41, %v133_v38  ;;  %v1474_v47 = vpack.c.bf16 %v425_v43, %v424_v40  ;;  %v718_v52 = vld [vmem:[#allocation2 + $0x14] sm:$0xff]  ;;  %v719_v53 = vld [vmem:[#allocation2 + $0x1c] sm:$0xff] }
  0xb1   :  { %v135_v48 = vpack.c.bf16 %v132_v45, %v131_v44  ;;  %526 = vrot.lane.b32.xlu1 %v1472_v42, %s1401_s1  ;;  %v716_v54 = vld [vmem:[#allocation2 + $0x2] sm:$0xff]  ;;  %v717_v55 = vld [vmem:[#allocation2 + $0xa] sm:$0xff]  ;;  %v1486_v57 = vpack.c.bf16 %v719_v53, %v718_v52 }
  0xb2   :  { %524 = vrot.lane.b32.xlu0 %v1474_v47, %s1401_s1  ;;  %v720_v58 = vpack.c.bf16 %v717_v55, %v716_v54 }
  0xb3   :  { %1140 = vmatprep.mubr.msk.bf16.mxu1 %vm161_vm7, %v135_v48 }
  0xb4   :  { %1141 = vmatmul.mubr.msk.bf16.vlgmr.msra.gmra.mrb[0].mxu1 %vm161_vm7, %v136_v46 }
  0xb5   :  { %1145 = vmatpush3.bf16.msra.mxu1 %v1292_v29  ;;  %622 = vrot.lane.b32.xlu1 %v1472_v42, %s1402_s2 }
  0xb6   :  { %1146 = vmatprep.subr.bf16.mxu1 %v1294_v49  ;;  %620 = vrot.lane.b32.xlu0 %v1474_v47, %s1402_s2 }
  0xb9   :  { %1147 = vmatpush3.bf16.msra.mxu1 %v1294_v49  ;;  %234 = vrot.lane.b32.xlu1 %v136_v46, %s1401_s1 }
  0xba   :  { %1148 = vmatprep.subr.bf16.mxu1 %v1296_v50  ;;  %232 = vrot.lane.b32.xlu0 %v135_v48, %s1401_s1 }
  0xbd   :  { %1149 = vmatpush3.bf16.msra.mxu1 %v1296_v50  ;;  %330 = vrot.lane.b32.xlu1 %v136_v46, %s1402_s2 }
  0xbe   :  { %1150 = vmatprep.subr.bf16.mxu1 %v1298_v51  ;;  %328 = vrot.lane.b32.xlu0 %v135_v48, %s1402_s2 }
  0xc1   :  { %1151 = vmatpush3.bf16.msra.mxu1 %v1298_v51  ;;  %818 = vrot.lane.b32.xlu1 %v1486_v57, %s1401_s1 }
  0xc2   :  { %1156 = vmatprep.subr.bf16.mxu1 %v1300_v56  ;;  %816 = vrot.lane.b32.xlu0 %v720_v58, %s1401_s1 }
  0xc5   :  { %914 = vrot.lane.b32.xlu1 %v1486_v57, %s1402_s2 }
  0xc6   :  { %912 = vrot.lane.b32.xlu0 %v720_v58, %s1402_s2 }
 0x123   :  { %v527_v59 = vpop.permute.xlu1 %526 }
 0x124   :  { %v525_v60 = vpop.permute.xlu0 %524 }
 0x125   :  { %1188 = vmatprep.mubr.msk.bf16.mxu0 %vm161_vm7, %v525_v60 }
 0x126   :  { %1189 = vmatmul.mubr.msk.bf16.vlgmr.msra.gmra.mrb[0].mxu0 %vm161_vm7, %v527_v59 }
 0x127   :  { %1193 = vmatpush3.bf16.msra.mxu0 %v1297_v34  ;;  %v623_v62 = vpop.permute.xlu1 %622 }
 0x128   :  { %v621_v63 = vpop.permute.xlu0 %620  ;;  %1194 = vmatprep.subr.bf16.mxu0 %v1299_v61 }
 0x129   :  { %1200 = vmatprep.mubr.msk.bf16.mxu0 %vm161_vm7, %v621_v63 }
 0x12b   :  { %1195 = vmatpush3.bf16.msra.mxu0 %v1299_v61  ;;  %v235_v1 = vpop.permute.xlu1 %234 }
 0x12c   :  { %v233_v2 = vpop.permute.xlu0 %232  ;;  %1196 = vmatprep.subr.bf16.mxu0 %v1301_v0 }
 0x12d   :  { %1152 = vmatprep.mubr.msk.bf16.mxu1 %vm161_vm7, %v233_v2 }
 0x12e   :  { %1153 = vmatmul.mubr.msk.bf16.vlgmr.msra.gmra.mrb[0].mxu1 %vm161_vm7, %v235_v1 }
 0x12f   :  { %1157 = vmatpush3.bf16.msra.mxu1 %v1300_v56  ;;  %1197 = vmatpush3.bf16.msra.mxu0 %v1301_v0  ;;  %v331_v13 = vpop.permute.xlu1 %330 }
 0x130   :  { %v329_v5 = vpop.permute.xlu0 %328  ;;  %1158 = vmatprep.subr.bf16.mxu1 %v1302_v3  ;;  %1198 = vmatprep.subr.bf16.mxu0 %v1303_v4 }
 0x131   :  { %1164 = vmatprep.mubr.msk.bf16.mxu1 %vm161_vm7, %v329_v5 }
 0x133   :  { %1159 = vmatpush3.bf16.msra.mxu1 %v1302_v3  ;;  %1199 = vmatpush3.bf16.msra.mxu0 %v1303_v4  ;;  %v819_v24 = vpop.permute.xlu1 %818 }
 0x134   :  { %1160 = vmatprep.subr.bf16.mxu1 %v1304_v6  ;;  %1204 = vmatprep.subr.bf16.mxu0 %v1305_v7  ;;  %v817_v19 = vpop.permute.xlu0 %816 }
 0x136   :  { %1201 = vmatmul.mubr.msk.bf16.vlgmr.msra.gmra.mrb[0].mxu0 %vm161_vm7, %v623_v62 }
 0x137   :  { %1161 = vmatpush3.bf16.msra.mxu1 %v1304_v6  ;;  %1205 = vmatpush3.bf16.msra.mxu0 %v1305_v7  ;;  %v915_v28 = vpop.permute.xlu1 %914 }
 0x138   :  { %1212 = vmatprep.mubr.msk.bf16.mxu0 %vm161_vm7, %v720_v58  ;;  %1162 = vmatprep.subr.bf16.mxu1 %v1306_v8  ;;  %v913_v25 = vpop.permute.xlu0 %912 }
 0x139   :  { %1206 = vmatprep.subr.bf16.mxu0 %v1307_v9 }
 0x13b   :  { %1163 = vmatpush3.bf16.msra.mxu1 %v1306_v8  ;;  %1207 = vmatpush3.bf16.msra.mxu0 %v1307_v9 }
 0x13c   :  { %1168 = vmatprep.subr.bf16.mxu1 %v1308_v10  ;;  %1208 = vmatprep.subr.bf16.mxu0 %v1309_v11 }
 0x13e   :  { %1165 = vmatmul.mubr.msk.bf16.vlgmr.msra.gmra.mrb[0].mxu1 %vm161_vm7, %v331_v13 }
 0x13f   :  { %1169 = vmatpush3.bf16.msra.mxu1 %v1308_v10  ;;  %1176 = vmatprep.mubr.msk.bf16.mxu1 %vm161_vm7, %v1474_v47 }
 0x140   :  { %1209 = vmatpush3.bf16.msra.mxu0 %v1309_v11  ;;  %1170 = vmatprep.subr.bf16.mxu1 %v1310_v12 }
 0x141   :  { %1210 = vmatprep.subr.bf16.mxu0 %v1311_v14 }
 0x143   :  { %1171 = vmatpush3.bf16.msra.mxu1 %v1310_v12 }
 0x144   :  { %1211 = vmatpush3.bf16.msra.mxu0 %v1311_v14  ;;  %1172 = vmatprep.subr.bf16.mxu1 %v1312_v15 }
 0x145   :  { %1216 = vmatprep.subr.bf16.mxu0 %v1313_v16 }
 0x147   :  { %1213 = vmatmul.mubr.msk.bf16.vlgmr.msra.gmra.mrb[0].mxu0 %vm161_vm7, %v1486_v57  ;;  %1173 = vmatpush3.bf16.msra.mxu1 %v1312_v15 }
 0x148   :  { %1217 = vmatpush3.bf16.msra.mxu0 %v1313_v16  ;;  %1224 = vmatprep.mubr.msk.bf16.mxu0 %vm161_vm7, %v817_v19 }
 0x149   :  { %1174 = vmatprep.subr.bf16.mxu1 %v1314_v17  ;;  %1218 = vmatprep.subr.bf16.mxu0 %v1315_v18 }
 0x14b   :  { %1175 = vmatpush3.bf16.msra.mxu1 %v1314_v17 }
 0x14c   :  { %1219 = vmatpush3.bf16.msra.mxu0 %v1315_v18 }
 0x14d   :  { %1220 = vmatprep.subr.bf16.mxu0 %v1316_v20 }
 0x14e   :  { %1177 = vmatmul.mubr.msk.bf16.vlgmr.msra.gmra.mrb[0].mxu1 %vm161_vm7, %v1472_v42 }
 0x150   :  { %1221 = vmatpush3.bf16.msra.mxu0 %v1316_v20 }
 0x151   :  { %1222 = vmatprep.subr.bf16.mxu0 %v1317_v21 }
 0x154   :  { %1223 = vmatpush3.bf16.msra.mxu0 %v1317_v21 }
 0x155   :  { %1228 = vmatprep.subr.bf16.mxu0 %v1318_v22 }
 0x157   :  { %1225 = vmatmul.mubr.msk.bf16.vlgmr.msra.gmra.mrb[0].mxu0 %vm161_vm7, %v819_v24 }
 0x158   :  { %1229 = vmatpush3.bf16.msra.mxu0 %v1318_v22  ;;  %1236 = vmatprep.mubr.msk.bf16.mxu0 %vm161_vm7, %v913_v25 }
 0x159   :  { %1230 = vmatprep.subr.bf16.mxu0 %v1319_v23 }
 0x15c   :  { %1231 = vmatpush3.bf16.msra.mxu0 %v1319_v23 }
 0x15d   :  { %1232 = vmatprep.subr.bf16.mxu0 %v1320_v26 }
 0x160   :  { %1233 = vmatpush3.bf16.msra.mxu0 %v1320_v26 }
 0x161   :  { %1234 = vmatprep.subr.bf16.mxu0 %v1321_v27 }
 0x164   :  { %1235 = vmatpush3.bf16.msra.mxu0 %v1321_v27 }
 0x167   :  { %1237 = vmatmul.mubr.msk.bf16.vlgmr.msra.gmra.mrb[0].mxu0 %vm161_vm7, %v915_v28 }
 0x221   :  { %v1178_v29 = vpop.f32.mrb[0].mxu1 }
 0x222   :  { %v494_v30 = vpop.f32.mrb[1].mxu1  ;;  %v1240_v34 = vadd.f32 %v1178_v29, %v1023_v33 }
 0x223   :  { %v1179_v31 = vpop.f32.mrb[2].mxu1  ;;  %v1242_v35 = vadd.f32 %v1023_v33, %v494_v30 }
 0x224   :  { %v497_v32 = vpop.f32.mrb[3].mxu1  ;;  %v1244_v37 = vadd.f32 %v1179_v31, %v1023_v33 }
 0x225   :  { %v1246_v40 = vadd.f32 %v1023_v33, %v497_v32 }
 0x23a   :  { %v1238_v36 = vpop.f32.mrb[0].mxu0 }
 0x23b   :  { %v1241_v38 = vadd.f32 %v1240_v34, %v1238_v36  ;;  %v980_v39 = vpop.f32.mrb[1].mxu0 }
 0x23c   :  { %v1243_v41 = vadd.f32 %v1242_v35, %v980_v39  ;;  %v1239_v42 = vpop.f32.mrb[2].mxu0 }
 0x23d   :  { %1001 = vst [vmem:[#allocation8 + $0x10] sm:$0xff] %v1241_v38  ;;  %v1245_v43 = vadd.f32 %v1244_v37, %v1239_v42  ;;  %v983_v44 = vpop.f32.mrb[3].mxu0 }
 0x23e   :  { %999 = vst [vmem:[#allocation8] sm:$0xff] %v1243_v41  ;;  %v1247_v45 = vadd.f32 %v1246_v40, %v983_v44 }
 0x23f   :  { %1002 = vst [vmem:[#allocation8 + $0x18] sm:$0xff] %v1245_v43 }
 0x240   :  { %1000 = vst [vmem:[#allocation8 + $0x8] sm:$0xff] %v1247_v45 }
 0x241   :  { %1377 = shalt.err (!%p1374_p6)
}
 0x242   :  { %s1378_s6 = scalar_lea.hbm %s1534_s5, 512 }
 0x243   :  { %p1379_p7 = scmp.ne.s32.totalorder %s1534_s5, %s1378_s6  ;;  %p1382_p8 = scmp.lt.u32.totalorder %s1378_s6, %s1534_s5 }
 0x245   :  { %p1384_p9 = pnand %p1382_p8, %p1379_p7 }
 0x247   :  { %1387 = shalt.err (!%p1384_p9)
}
 0x248   :  { %1014 = dma.vmem_to_hbm [thread:$0]  %s1009_s26, 512, %s1534_s5, [#allocation5], %s1395_s28, %s1395_s28, %s1396_s29  }
 0x249   :  { %1392 = dma.done.wait [#allocation5], 512  }
 0x24a   :  { %1393 = vsyncadd [#allocation5], 4294966784 }
 0x24b   :  { %1018 = vsyncpa [#allocation4], 1 }
 0x24c   :  { %1019 = vsyncpa [#allocation7], 1 }
 0x24d   :  { %1020 = vsyncpa [#allocation5], 1 }

</bundles_post_ra>
